<compile_context>
chip_gen: v7x
topology: tpu7x:2x2x1
jax: 0.10.0
libtpu: 0.0.40
codegen_flags: <defaults>
</compile_context>

<pallas_src>
import jax
import jax.numpy as jnp
from jax.experimental import pallas as pl
from jax.experimental.pallas import tpu as pltpu


def _dot(a, b, transpose_b=False):
    """2-D MXU matmul (bf16 operands expected), f32 accumulation."""
    dn = (((1,), (1,)), ((), ())) if transpose_b else (((1,), (0,)), ((), ()))
    return jax.lax.dot_general(a, b, dn, preferred_element_type=jnp.float32)


def fft_attention_kernel(q_ref, kfr_ref, kfi_ref, vf_ref, o_ref):
    # One (batch*head, q-tile) grid point:
    #   q_ref:   (tq, d)      bf16 query tile
    #   kfr_ref: (nh_pad, d)  bf16 Re(rfft(k))  (precomputed in the wrapper)
    #   kfi_ref: (nh_pad, d)  bf16 Im(rfft(k))
    #   vf_ref:  (nh_pad, d)  bf16 Hermitian-folded values
    #   o_ref:   (tq, d)      f32 output tile
    q = q_ref[...]
    tr = _dot(q, kfr_ref[...], transpose_b=True)        # (tq, nh_pad) f32
    ti = _dot(q, kfi_ref[...], transpose_b=True)        # (tq, nh_pad) f32
    # |ifft(fft(q) @ fft(k)^T, axis=-2)| == |q @ fft(k)^T|  (exact cancellation)
    s = tr * tr + ti * ti
    a = s * jax.lax.rsqrt(jnp.maximum(s, 1e-30))        # |T|; EUP rsqrt, 0-safe
    # TODO(synk): possible micro-opts per review — fuse the two dots above into
    # one (tq, 2*nh_pad) matmul with a 128-aligned re/im split, and pack p
    # heads per block so the stored output is lane-dense when d < 128.
    o_ref[...] = _dot(a.astype(jnp.bfloat16), vf_ref[...])


def _round_up(x, m):
    return (x + m - 1) // m * m


def _pick_tq(n, nh_pad):
    """Query-row tile: whole sequence when small, else bounded by a VMEM budget
    for the three (tq, nh_pad) f32 temporaries (safe under the 32 MiB default
    scoped limit on v6e/v7x and the 48 MiB limit requested below)."""
    if n <= 512:
        return n
    budget = 16 * 1024 * 1024
    for tq in (1024, 512, 256, 128):
        if n % tq == 0 and 3 * tq * nh_pad * 4 <= budget:
            return tq
    return n


def fft_attention(query, key, value, num_heads, tq=None):
    """query/key/value: (b, h*n, d) float32 -> (b, h*n, d) float32."""
    b, hn, d = query.shape
    h = num_heads
    n = hn // h
    bh = b * h
    q = query.reshape(bh, n, d).astype(jnp.float32)
    k = key.reshape(bh, n, d).astype(jnp.float32)
    v = value.reshape(bh, n, d).astype(jnp.float32)

    # ---- hoisted, f32-exact fft(k): half spectrum only (k is real) ----------
    nh = n // 2 + 1
    nh_pad = _round_up(nh, 8)
    kf = jnp.fft.rfft(k, axis=-2)                        # (bh, nh, d) complex64
    pad = ((0, 0), (0, nh_pad - nh), (0, 0))
    kfr = jnp.pad(jnp.real(kf), pad).astype(jnp.bfloat16)
    kfi = jnp.pad(jnp.imag(kf), pad).astype(jnp.bfloat16)

    # ---- Hermitian fold of v:  out = sum_{m in half} |T[:,m]| * v_fold[m] ---
    m = jnp.arange(nh)
    pair = (n - m) % n
    paired = (pair != m).astype(jnp.float32)[None, :, None]   # 0 for m=0, n/2
    v_fold = v[:, :nh, :] + paired * jnp.take(v, pair, axis=1)
    v_fold = jnp.pad(v_fold, pad).astype(jnp.bfloat16)

    q_bf = q.astype(jnp.bfloat16)

    if tq is None:
        tq = _pick_tq(n, nh_pad)
    assert n % tq == 0, "sequence length must be divisible by the q-tile size"
    nq = n // tq

    q_spec = pl.BlockSpec((None, tq, d), lambda bi, qi: (bi, qi, 0))
    half_spec = pl.BlockSpec((None, nh_pad, d), lambda bi, qi: (bi, 0, 0))
    out_spec = pl.BlockSpec((None, tq, d), lambda bi, qi: (bi, qi, 0))

    out = pl.pallas_call(
        fft_attention_kernel,
        out_shape=jax.ShapeDtypeStruct((bh, n, d), jnp.float32),
        grid_spec=pltpu.PrefetchScalarGridSpec(
            num_scalar_prefetch=0,
            grid=(bh, nq),
            in_specs=[q_spec, half_spec, half_spec, half_spec],
            out_specs=out_spec,
        ),
        compiler_params=pltpu.CompilerParams(
            dimension_semantics=("parallel", "parallel"),
            vmem_limit_bytes=48 * 1024 * 1024),
    )(q_bf, kfr, kfi, v_fold)

    return out.reshape(b, hn, d)


def fft_attention_reference(query, key, value, num_heads):
    """Pure-JAX reference mirroring the PyTorch forward (uses jnp.fft)."""
    b, hn, d = query.shape
    h = num_heads
    n = hn // h
    q = query.reshape(b, h, n, d).astype(jnp.complex64)
    k = key.reshape(b, h, n, d).astype(jnp.complex64)
    v = value.reshape(b, h, n, d)
    qf = jnp.fft.fft(q, axis=-2)
    kf = jnp.fft.fft(k, axis=-2)
    s = jnp.matmul(qf, jnp.swapaxes(kf, -1, -2))
    a = jnp.abs(jnp.fft.ifft(s, axis=-2)).astype(jnp.float32)
    out = jnp.matmul(a, v)
    return out.reshape(b, hn, d)


def _check(out, ref, tol=2e-2):
    # Error normalized to the output scale: the right metric for a bf16 MXU
    # kernel, whose absolute error scales with the accumulation magnitude
    # (a per-element rtol check fails on elements with benign cancellation).
    err = float(jnp.max(jnp.abs(out - ref)))
    scale = float(jnp.max(jnp.abs(ref)))
    rel = err / max(scale, 1e-30)
    assert rel <= tol, f"normalized max err = {rel:.5f} (tol {tol})"


if __name__ == "__main__":
    # Small shapes consistent with 'b (h n) d': b=2, num_heads=2, n=8, d=32.
    b, num_heads, n, d = 2, 2, 8, 32

    root = jax.random.PRNGKey(0)
    kq, kk, kv, kq2, kk2, kv2 = jax.random.split(root, 6)
    query = jax.random.normal(kq, (b, num_heads * n, d), dtype=jnp.float32)
    key_ = jax.random.normal(kk, (b, num_heads * n, d), dtype=jnp.float32)
    value = jax.random.normal(kv, (b, num_heads * n, d), dtype=jnp.float32)

    out = jax.block_until_ready(fft_attention(query, key_, value, num_heads))
    _check(out, fft_attention_reference(query, key_, value, num_heads))

    # Second small case exercising multiple q tiles per head (nq > 1),
    # addressing the review's "nq > 1 path never exercised" concern.
    n2 = 16
    query2 = jax.random.normal(kq2, (b, num_heads * n2, d), dtype=jnp.float32)
    key2 = jax.random.normal(kk2, (b, num_heads * n2, d), dtype=jnp.float32)
    value2 = jax.random.normal(kv2, (b, num_heads * n2, d), dtype=jnp.float32)

    out2 = jax.block_until_ready(
        fft_attention(query2, key2, value2, num_heads, tq=8))
    _check(out2, fft_attention_reference(query2, key2, value2, num_heads))

    print("KERNEL_OK")
</pallas_src>

<mosaic_0001>
module attributes {stable_mosaic.version = 11 : i64} {
  func.func @fft_attention_kernel(%arg0: i32, %arg1: i32, %arg2: memref<1x8x32xbf16, #tpu.memory_space<vmem>>, %arg3: memref<1x8x32xbf16, #tpu.memory_space<vmem>>, %arg4: memref<1x8x32xbf16, #tpu.memory_space<vmem>>, %arg5: memref<1x8x32xbf16, #tpu.memory_space<vmem>>, %arg6: memref<1x8x32xf32, #tpu.memory_space<vmem>>) attributes {dimension_semantics = [#tpu.dimension_semantics<parallel>, #tpu.dimension_semantics<parallel>], iteration_bounds = array<i64: 4, 1>, scalar_prefetch = 0 : i64, scratch_operands = 0 : i64, tpu.core_type = #tpu.core_type<tc>, window_params = [{transform_indices = @transform_0, window_bounds = array<i64: 1, 8, 32>}, {transform_indices = @transform_1, window_bounds = array<i64: 1, 8, 32>}, {transform_indices = @transform_2, window_bounds = array<i64: 1, 8, 32>}, {transform_indices = @transform_3, window_bounds = array<i64: 1, 8, 32>}, {transform_indices = @transform_4, window_bounds = array<i64: 1, 8, 32>}]} {
    %c0 = arith.constant 0 : index
    %c0_0 = arith.constant 0 : index
    %c0_1 = arith.constant 0 : index
    %0 = vector.load %arg2[%c0, %c0_0, %c0_1] : memref<1x8x32xbf16, #tpu.memory_space<vmem>>, vector<1x8x32xbf16>
    %1 = vector.shape_cast %0 : vector<1x8x32xbf16> to vector<8x32xbf16>
    %c0_2 = arith.constant 0 : index
    %c0_3 = arith.constant 0 : index
    %c0_4 = arith.constant 0 : index
    %2 = vector.load %arg3[%c0_2, %c0_3, %c0_4] : memref<1x8x32xbf16, #tpu.memory_space<vmem>>, vector<1x8x32xbf16>
    %3 = vector.shape_cast %2 : vector<1x8x32xbf16> to vector<8x32xbf16>
    %cst = arith.constant dense<0.000000e+00> : vector<8x8xf32>
    %4 = tpu.matmul %1, %3, %cst {dimension_numbers = #tpu.dot_dimension_numbers<[1], [1], [0], [0], [0, 0, 1, 0], [], []>} : vector<8x32xbf16>, vector<8x32xbf16>, vector<8x8xf32> -> vector<8x8xf32>
    %c0_5 = arith.constant 0 : index
    %c0_6 = arith.constant 0 : index
    %c0_7 = arith.constant 0 : index
    %5 = vector.load %arg4[%c0_5, %c0_6, %c0_7] : memref<1x8x32xbf16, #tpu.memory_space<vmem>>, vector<1x8x32xbf16>
    %6 = vector.shape_cast %5 : vector<1x8x32xbf16> to vector<8x32xbf16>
    %cst_8 = arith.constant dense<0.000000e+00> : vector<8x8xf32>
    %7 = tpu.matmul %1, %6, %cst_8 {dimension_numbers = #tpu.dot_dimension_numbers<[1], [1], [0], [0], [0, 0, 1, 0], [], []>} : vector<8x32xbf16>, vector<8x32xbf16>, vector<8x8xf32> -> vector<8x8xf32>
    %8 = arith.mulf %4, %4 : vector<8x8xf32>
    %9 = arith.mulf %7, %7 : vector<8x8xf32>
    %10 = arith.addf %8, %9 : vector<8x8xf32>
    %cst_9 = arith.constant 1.000000e-30 : f32
    %11 = vector.broadcast %cst_9 : f32 to vector<8x8xf32>
    %12 = arith.maximumf %10, %11 : vector<8x8xf32>
    %13 = math.rsqrt %12 : vector<8x8xf32>
    %14 = arith.mulf %10, %13 : vector<8x8xf32>
    %15 = arith.truncf %14 : vector<8x8xf32> to vector<8x8xbf16>
    %c0_10 = arith.constant 0 : index
    %c0_11 = arith.constant 0 : index
    %c0_12 = arith.constant 0 : index
    %16 = vector.load %arg5[%c0_10, %c0_11, %c0_12] : memref<1x8x32xbf16, #tpu.memory_space<vmem>>, vector<1x8x32xbf16>
    %17 = vector.shape_cast %16 : vector<1x8x32xbf16> to vector<8x32xbf16>
    %cst_13 = arith.constant dense<0.000000e+00> : vector<8x32xf32>
    %18 = tpu.matmul %15, %17, %cst_13 {dimension_numbers = #tpu.dot_dimension_numbers<[1], [0], [0], [1], [0, 0, 1, 1], [], []>} : vector<8x8xbf16>, vector<8x32xbf16>, vector<8x32xf32> -> vector<8x32xf32>
    %c0_14 = arith.constant 0 : index
    %c0_15 = arith.constant 0 : index
    %c0_16 = arith.constant 0 : index
    %19 = vector.load %arg6[%c0_14, %c0_15, %c0_16] : memref<1x8x32xf32, #tpu.memory_space<vmem>>, vector<1x8x32xf32>
    %20 = vector.shape_cast %19 : vector<1x8x32xf32> to vector<8x32xf32>
    %21 = vector.shape_cast %18 : vector<8x32xf32> to vector<1x8x32xf32>
    tpu.vector_store %arg6[%c0_14, %c0_15, %c0_16], %21 {strides = array<i32>} : memref<1x8x32xf32, #tpu.memory_space<vmem>>, vector<1x8x32xf32>,
    return
  }
  func.func @transform_0(%arg0: i32, %arg1: i32) -> (i32, i32, i32) {
    %c0_i32 = arith.constant 0 : i32
    %c0_i32_0 = arith.constant 0 : i32
    return %arg0, %arg1, %c0_i32 : i32, i32, i32
  }
  func.func @transform_1(%arg0: i32, %arg1: i32) -> (i32, i32, i32) {
    %c0_i32 = arith.constant 0 : i32
    %c0_i32_0 = arith.constant 0 : i32
    %c0_i32_1 = arith.constant 0 : i32
    return %arg0, %c0_i32, %c0_i32_0 : i32, i32, i32
  }
  func.func @transform_2(%arg0: i32, %arg1: i32) -> (i32, i32, i32) {
    %c0_i32 = arith.constant 0 : i32
    %c0_i32_0 = arith.constant 0 : i32
    %c0_i32_1 = arith.constant 0 : i32
    return %arg0, %c0_i32, %c0_i32_0 : i32, i32, i32
  }
  func.func @transform_3(%arg0: i32, %arg1: i32) -> (i32, i32, i32) {
    %c0_i32 = arith.constant 0 : i32
    %c0_i32_0 = arith.constant 0 : i32
    %c0_i32_1 = arith.constant 0 : i32
    return %arg0, %c0_i32, %c0_i32_0 : i32, i32, i32
  }
  func.func @transform_4(%arg0: i32, %arg1: i32) -> (i32, i32, i32) {
    %c0_i32 = arith.constant 0 : i32
    %c0_i32_0 = arith.constant 0 : i32
    return %arg0, %arg1, %c0_i32 : i32, i32, i32
  }
}

</mosaic_0001>

<bundles_post_ra>
// kernel: tpu_custom_call.1
= control target key start
LH: loop header
LB: loop body
LE: loop exit
PB: predicated region body
PF: predicated region fallthrough
CT: control target
= control target key end

     0   :  { %s1322_s0 = inlined_call_operand.hbm [shape: bf16[4,8,32], index: 0, kind: input, shape index: {}]   ;;  %s1323_s1 = inlined_call_operand.hbm [shape: bf16[4,8,32], index: 1, kind: input, shape index: {}]   ;;  %s1324_s2 = inlined_call_operand.hbm [shape: bf16[4,8,32], index: 2, kind: input, shape index: {}]   ;;  %s1325_s3 = inlined_call_operand.hbm [shape: bf16[4,8,32], index: 3, kind: input, shape index: {}]   ;;  %s1326_s4 = inlined_call_operand.hbm [shape: f32[4,8,32], index: 4, kind: output, shape index: {}]  }
   0x1   :  { %1335 = sst [smem:[#allocation20_spill]] %s1323_s1 }
   0x2   :  { %9 = vsyncpa [#allocation3], 0 }
   0x3   :  { %11 = vsyncpa [#allocation3 + $0x1], 0 }
   0x4   :  { %12 = vsyncpa [#allocation6], 0 }
   0x5   :  { %14 = vsyncpa [#allocation6 + $0x1], 0 }
   0x6   :  { %15 = vsyncpa [#allocation9], 0 }
   0x7   :  { %17 = vsyncpa [#allocation9 + $0x1], 0 }
   0x8   :  { %18 = vsyncpa [#allocation4], 0 }
   0x9   :  { %20 = vsyncpa [#allocation4 + $0x1], 0  ;;  %s1024_s15 = smov 0   ;;  %s1026_s16 = smov 0  }
   0xa   :  { %s1028_s17 = smov 0   ;;  %s1030_s18 = smov 0  }
   0xb   :  { %s1032_s19 = smov 0   ;;  %s1034_s20 = smov 0  }
   0xc LB: > { %1336 = sst [smem:[#allocation15_spill]] %s978_s17  ;;  %s1055_s21 = sadd.s32 4294967295, %s990_s20   ;;  %s990_s20 = sphi %s1034_s20, %s26_s20   ;;  %s986_s19 = sphi %s1032_s19, %s1361_s19   ;;  %s982_s18 = sphi %s1030_s18, %s1360_s18   ;;  %s978_s17 = sphi %s1028_s17, %s1359_s17   ;;  %s974_s16 = sphi %s1026_s16, %s1363_s16   ;;  %s970_s15 = sphi %s1024_s15, %s1362_s15  }
   0xd   : > { %1337 = sst [smem:[#allocation16_spill]] %s986_s19  ;;  %s651_s22 = sadd.s32 4294967294, %s990_s20  }
   0xe   : > { %s38_s23 = sadd.s32 1, %s986_s19  ;;  %s47_s24 = sadd.s32 1, %s978_s17 }
   0xf   : > { %p40_p0 = scmp.ge.s32.totalorder %s38_s23, 4  ;;  %p54_p1 = scmp.ne.s32.totalorder %s978_s17, %s974_s16 }
  0x10   : > { %p55_p2 = scmp.eq.s32.totalorder %s990_s20, 0  ;;  %p60_p3 = scmp.ne.s32.totalorder %s974_s16, %s970_s15 }
  0x11   : > { %s1365_s23 = smov (%p40_p0, %s38_s23), 0  ;;  %p61_p5 = scmp.eq.s32.totalorder %s1055_s21, 0 }
  0x12   : > { %1338 = sst [smem:[#allocation17_spill]] %s1365_s23  ;;  %p1067_p4 = por %p55_p2, %p54_p1 }
  0x13   : > { %s42_s26 = ssub.s32 %s986_s19, %s1365_s23  ;;  %p164_p6 = scmp.eq.s32.totalorder %s1055_s21, 3 }
  0x14   : > { %p45_p7 = scmp.eq.s32.totalorder %s42_s26, 0  ;;  %p1075_p8 = por %p61_p5, %p60_p3 }
  0x15   : > { %p1079_p9 = por %p164_p6, %p54_p1  ;;  %p170_p10 = scmp.eq.s32.totalorder %s651_s22, 3 }
  0x16   : > { %s1340_s27 = scalar_select %p1075_p8, 1, 0 }
  0x17   : > { %s1341_s28 = scalar_select %p1079_p9, 1, 0 }
  0x18   : > { %s1084_s29 = scalar_select %p45_p7, %s978_s17, %s47_s24  }
  0x19   : > { %p1086_p11 = por %p170_p10, %p60_p3  ;;  %p726_p12 = scmp.lt.s32.totalorder %s990_s20, 4 }
  0x1a   : > { %1342 = sst [smem:[#allocation18_spill]] %s1084_s29  ;;  %s1092_s5 = sand.u32 1, %s978_s17  }
  0x1b   : > { %s1343_s30 = scalar_select %p1086_p11, 1, 0 }
  0x1c   : > { %s1095_s6 = sshll.u32 %s1092_s5, 2  ;;  %s1098_s7 = sshll.u32 %s986_s19, 6 }
  0x1d   : > { %1344 = sst [smem:[#allocation19_spill]] %s1343_s30  ;;  %p1102_p13 = pnand %p726_p12, %p1067_p4 }
  0x1e   : > { %s209_s9 = sand.u32 1, %s990_s20   ;;  %s1346_s1 = sld [smem:[#allocation20_spill]] }
  0x1f   : > { %s1345_s8 = scalar_select %p1102_p13, 1, 0 }
  0x20   : > { %s213_s13 = scalar_lea.vmem [#allocation5], %s1095_s6  ;;  %s1118_s22 = scalar_lea.sflag [#allocation6], %s209_s9 }
  0x21   : > { %s220_s14 = sshll.u32 %s213_s13, 4  ;;  %p1124_p3 = pneg %p1102_p13  ;;  %s1115_s14 = int_to_ptr.vmem [resolvable:$true] %s220_s14 }
  0x24   : > { %s1111_s12 = scalar_lea.hbm %s1346_s1, %s1098_s7  ;;  %s785_s11 = scalar_lea.hbm %s1346_s1, 256 }
  0x25   : > { %s780_s24 = scalar_lea.hbm %s1111_s12, 64  ;;  %p786_p6 = scmp.lt.u32.totalorder %s1111_s12, %s1346_s1 }
  0x26   : > { %p781_p2 = scmp.ne.s32.totalorder %s1111_s12, %s780_s24  ;;  %p787_p7 = scmp.lt.u32.totalorder %s785_s11, %s780_s24 }
  0x27   : > { %p789_p12 = scmp.lt.u32.totalorder %s780_s24, %s1111_s12 }
  0x28   : > { %p783_p4 = pnand %p1124_p3, %p781_p2  ;;  %p788_p10 = por %p787_p7, %p786_p6 }
  0x2a   : > { %p784_p5 = pneg %p783_p4  ;;  %p790_p0 = por %p789_p12, %p788_p10 }
  0x2c   : > { %p791_p1 = pnand %p790_p0, %p784_p5 }
  0x2e   : > { %794 = shalt.err (!%p791_p1)
}
  0x2f   : > { %s795_s9 = scalar_lea.vmem %s1115_s14, 64  ;;  %s992_s26 = smov [#allocation5]  }
  0x30   : > { %p796_p2 = scmp.ne.s32.totalorder %s1115_s14, %s795_s9  ;;  %s800_s10 = sshll.u32 %s992_s26, 4  ;;  %s801_s10 = int_to_ptr.vmem [resolvable:$false] %s800_s10 }
  0x31   : > { %s802_s23 = scalar_lea.vmem %s801_s10, 128  ;;  %p803_p9 = scmp.lt.s32.totalorder %s1115_s14, %s801_s10 }
  0x32   : > { %p798_p4 = pnand %p796_p2, %p1124_p3  ;;  %p804_p8 = scmp.lt.s32.totalorder %s802_s23, %s795_s9 }
  0x34   : > { %p799_p11 = pneg %p798_p4  ;;  %p805_p6 = por %p804_p8, %p803_p9 }
  0x36   : > { %p806_p7 = pnand %p805_p6, %p799_p11 }
  0x38   : > { %809 = shalt.err (!%p806_p7)
}
  0x39   : > { %715 = dma.hbm_to_vmem [thread:$0]  (!%p1102_p13), %s1111_s12, 64, %s1115_s14, %s1118_s22  }
  0x3a   : > { %p1348_p0 = scmp.lt.s32.totalorder %s990_s20, 5  ;;  %p1349_p1 = scmp.ge.s32.totalorder %s990_s20, 1 }
  0x3b   : > { %s1160_s9 = scalar_lea.hbm %s1322_s0, %s1098_s7  ;;  %s194_s26 = scalar_lea.vmem [#allocation2], %s1095_s6 }
  0x3c   : > { %p1152_p5 = pnand %p1349_p1, %p1348_p0  ;;  %s202_s10 = sshll.u32 %s194_s26, 4  ;;  %s1163_s10 = int_to_ptr.vmem [resolvable:$true] %s202_s10 }
  0x3d   : > { %s1169_s23 = scalar_lea.hbm %s1324_s2, %s1098_s7  ;;  %s191_s1 = scalar_lea.sflag [#allocation3], %s1092_s5 }
  0x3e   : > { %s1350_s24 = scalar_select %p1152_p5, 1, 0 }
  0x3f   : > { %s810_s19 = scalar_lea.hbm %s1160_s9, 64  ;;  %s815_s29 = scalar_lea.hbm %s1322_s0, 256 }
  0x40   : > { %p811_p8 = scmp.ne.s32.totalorder %s1160_s9, %s810_s19  ;;  %p816_p10 = scmp.lt.u32.totalorder %s1160_s9, %s1322_s0 }
  0x41   : > { %p817_p12 = scmp.lt.u32.totalorder %s815_s29, %s810_s19  ;;  %p819_p4 = scmp.lt.u32.totalorder %s810_s19, %s1160_s9 }
  0x42   : > { %p813_p9 = pnand %p811_p8, %p1124_p3 }
  0x43   : > { %p818_p2 = por %p817_p12, %p816_p10 }
  0x44   : > { %p814_p11 = pneg %p813_p9 }
  0x45   : > { %p820_p6 = por %p819_p4, %p818_p2 }
  0x47   : > { %p821_p7 = pnand %p820_p6, %p814_p11 }
  0x49   : > { %824 = shalt.err (!%p821_p7)
}
  0x4a   : > { %s825_s26 = scalar_lea.vmem %s1163_s10, 64  ;;  %s993_s12 = smov [#allocation2]  }
  0x4b   : > { %p826_p0 = scmp.ne.s32.totalorder %s1163_s10, %s825_s26  ;;  %s830_s14 = sshll.u32 %s993_s12, 4  ;;  %s831_s14 = int_to_ptr.vmem [resolvable:$false] %s830_s14 }
  0x4c   : > { %s832_s17 = scalar_lea.vmem %s831_s14, 128  ;;  %p833_p9 = scmp.lt.s32.totalorder %s1163_s10, %s831_s14 }
  0x4d   : > { %p828_p1 = pnand %p826_p0, %p1124_p3  ;;  %p834_p5 = scmp.lt.s32.totalorder %s832_s17, %s825_s26 }
  0x4f   : > { %p829_p8 = pneg %p828_p1  ;;  %p835_p10 = por %p834_p5, %p833_p9 }
  0x51   : > { %p836_p12 = pnand %p835_p10, %p829_p8 }
  0x53   : > { %839 = shalt.err (!%p836_p12)
}
  0x54   : > { %712 = dma.hbm_to_vmem [thread:$0]  (!%p1102_p13), %s1160_s9, 64, %s1163_s10, %s191_s1  }
  0x55   : > { %s231_s19 = scalar_lea.vmem [#allocation7], %s1095_s6  ;;  %s840_s30 = scalar_lea.hbm %s1169_s23, 64 }
  0x56   : > { %s238_s29 = sshll.u32 %s231_s19, 4  ;;  %p841_p11 = scmp.ne.s32.totalorder %s1169_s23, %s840_s30  ;;  %s239_s29 = int_to_ptr.vmem [resolvable:$true] %s238_s29 }
  0x57   : > { %s845_s26 = scalar_lea.hbm %s1324_s2, 256  ;;  %p846_p4 = scmp.lt.u32.totalorder %s1169_s23, %s1324_s2 }
  0x58   : > { %p843_p5 = pnand %p841_p11, %p1124_p3  ;;  %p847_p6 = scmp.lt.u32.totalorder %s845_s26, %s840_s30 }
  0x59   : > { %p849_p0 = scmp.lt.u32.totalorder %s840_s30, %s1169_s23 }
  0x5a   : > { %p844_p2 = pneg %p843_p5  ;;  %p848_p7 = por %p847_p6, %p846_p4 }
  0x5c   : > { %p850_p1 = por %p849_p0, %p848_p7 }
  0x5e   : > { %p851_p8 = pnand %p850_p1, %p844_p2 }
  0x60   : > { %854 = shalt.err (!%p851_p8)
}
  0x61   : > { %s855_s1 = scalar_lea.vmem %s239_s29, 64  ;;  %s994_s9 = smov [#allocation7]  }
  0x62   : > { %p856_p9 = scmp.ne.s32.totalorder %s239_s29, %s855_s1  ;;  %s860_s10 = sshll.u32 %s994_s9, 4  ;;  %s861_s10 = int_to_ptr.vmem [resolvable:$false] %s860_s10 }
  0x63   : > { %s862_s17 = scalar_lea.vmem %s861_s10, 128  ;;  %p863_p11 = scmp.lt.s32.totalorder %s239_s29, %s861_s10 }
  0x64   : > { %p858_p10 = pnand %p856_p9, %p1124_p3  ;;  %p864_p5 = scmp.lt.s32.totalorder %s862_s17, %s855_s1 }
  0x66   : > { %p859_p12 = pneg %p858_p10  ;;  %p865_p13 = por %p864_p5, %p863_p11 }
  0x68   : > { %p866_p4 = pnand %p865_p13, %p859_p12 }
  0x6a   : > { %869 = shalt.err (!%p866_p4)
}
  0x6b   : > { %p1351_p6 = scmp.ne.s32.totalorder %s1345_s8, 0  ;;  %s1216_s11 = scalar_lea.hbm %s1325_s3, %s1098_s7 }
  0x6c   : > { %s249_s13 = scalar_lea.vmem [#allocation8], %s1095_s6  ;;  %s246_s12 = scalar_lea.sflag [#allocation9], %s1092_s5 }
  0x6d   : > { %718 = dma.hbm_to_vmem [thread:$0]  (!%p1351_p6), %s1169_s23, 64, %s239_s29, %s1118_s22  }
  0x6e   : > { %s256_s26 = sshll.u32 %s249_s13, 4  ;;  %s870_s14 = scalar_lea.hbm %s1216_s11, 64  ;;  %s257_s26 = int_to_ptr.vmem [resolvable:$true] %s256_s26 }
  0x6f   : > { %p871_p13 = scmp.ne.s32.totalorder %s1216_s11, %s870_s14  ;;  %s875_s23 = scalar_lea.hbm %s1325_s3, 256 }
  0x70   : > { %p876_p0 = scmp.lt.u32.totalorder %s1216_s11, %s1325_s3  ;;  %p877_p1 = scmp.lt.u32.totalorder %s875_s23, %s870_s14 }
  0x71   : > { %p873_p2 = pnand %p871_p13, %p1124_p3  ;;  %p879_p9 = scmp.lt.u32.totalorder %s870_s14, %s1216_s11 }
  0x72   : > { %p878_p8 = por %p877_p1, %p876_p0 }
  0x73   : > { %p874_p7 = pneg %p873_p2 }
  0x74   : > { %p880_p10 = por %p879_p9, %p878_p8 }
  0x76   : > { %p881_p12 = pnand %p880_p10, %p874_p7 }
  0x78   : > { %884 = shalt.err (!%p881_p12)
}
  0x79   : > { %s885_s5 = scalar_lea.vmem %s257_s26, 64  ;;  %s995_s6 = smov [#allocation8]  }
  0x7a   : > { %p886_p11 = scmp.ne.s32.totalorder %s257_s26, %s885_s5  ;;  %s890_s9 = sshll.u32 %s995_s6, 4  ;;  %s891_s9 = int_to_ptr.vmem [resolvable:$false] %s890_s9 }
  0x7b   : > { %s892_s10 = scalar_lea.vmem %s891_s9, 128  ;;  %p893_p13 = scmp.lt.s32.totalorder %s257_s26, %s891_s9 }
  0x7c   : > { %p888_p5 = pnand %p886_p11, %p1124_p3  ;;  %p894_p2 = scmp.lt.s32.totalorder %s892_s10, %s885_s5 }
  0x7e   : > { %p889_p4 = pneg %p888_p5  ;;  %p895_p6 = por %p894_p2, %p893_p13 }
  0x80   : > { %p896_p0 = pnand %p895_p6, %p889_p4 }
  0x82   : > { %899 = shalt.err (!%p896_p0)
}
  0x83   : > { %p1352_p1 = scmp.ne.s32.totalorder %s1345_s8, 0  ;;  %p1353_p7 = scmp.ne.s32.totalorder %s1350_s24, 0 }
  0x84   : > { %s1240_s25 = sand.u32 (!%p1353_p7), 1, %s974_s16   ;;  %p1354_p3 = scmp.ne.s32.totalorder (!%p1353_p7), %s1340_s27, 0 }
  0x85   : > { %721 = dma.hbm_to_vmem [thread:$0]  (!%p1352_p1), %s1216_s11, 64, %s257_s26, %s246_s12  }
  0x86   : > { %265 = sbr.rel (%p1353_p7) target bundleno = 618 (0x26a), region = 36  ;;  %s1243_s17 = sshll.u32 (!%p1353_p7), %s1240_s25, 2 }
  0x87   : > { %s268_s19 = scalar_lea.sflag (!%p1353_p7), [#allocation3], %s1240_s25  ;;  %s271_s30 = scalar_lea.vmem (!%p1353_p7), [#allocation2], %s1243_s17 }
  0x8d   : > { %953 = dma.done.wait (%p1354_p3), %s268_s19, 64  }
  0x8e   : > { %955 = vsyncadd (%p1354_p3), %s268_s19, 4294967232  ;;  %s276_s8 = sand.u32 1, %s1055_s21   ;;  %s280_s11 = scalar_lea.vmem [#allocation5], %s1243_s17 }
  0x8f   : > { %s277_s24 = scalar_lea.sflag [#allocation6], %s276_s8 }
  0x90   : > { %957 = dma.done.wait (%p1354_p3), %s277_s24, 128  }
  0x91   : > { %959 = vsyncadd (%p1354_p3), %s277_s24, 4294967168  ;;  %s289_s13 = scalar_lea.vmem [#allocation7], %s1243_s17  ;;  %s295_s26 = scalar_lea.sflag [#allocation9], %s1240_s25 }
  0x92   : > { %s298_s12 = scalar_lea.vmem [#allocation8], %s1243_s17 }
  0x93   : > { %961 = dma.done.wait (%p1354_p3), %s295_s26, 64  }
  0x94   : > { %963 = vsyncadd (%p1354_p3), %s295_s26, 4294967232  ;;  %v996_v0 = vmov 0.0   ;;  %vm997_vm0 = vmmov 0   ;;  %vm341_vm1 = vcmask 261120   ;;  %v340_v1 = vld [vmem:[%s280_s11] sm:$0xf] }
  0x95   : > { %681 = vmatprep.subr.bf16.mxu0 %v996_v0  ;;  %687 = vmatprep.subr.bf16.mxu1 %v996_v0  ;;  %v388_v2 = vld [vmem:[%s289_s13] sm:$0xf]  ;;  %v346_v3 = vsel %vm341_vm1, %v340_v1, 0  ;;  %v339_v5 = vld [vmem:[%s271_s30] sm:$0xf]  ;;  %vm444_vm2 = vcmask 1043456  }
  0x96   : > { %683 = vmatprep.mubr.msk.bf16.mxu0 %vm997_vm0, %v996_v0  ;;  %689 = vmatprep.mubr.msk.bf16.mxu1 %vm997_vm0, %v996_v0  ;;  %v390_v4 = vsel %vm341_vm1, %v388_v2, 0  ;;  %v439_v6 = vld [vmem:[%s298_s12] sm:$0xf]  ;;  %vm440_vm3 = vcmask 64512   ;;  %s667_s21 = sshll.u32 %s1240_s25, 3  ;;  %s672_s27 = sshll.u32 %s982_s18, 7 }
  0x97   : > { %682 = vmatpush3.bf16.xpose.msra.mxu0 %v346_v3  ;;  %688 = vmatpush3.bf16.xpose.msra.mxu1 %v390_v4  ;;  %v446_v7 = vsel %vm444_vm2, %v439_v6, 0  ;;  %s337_s14 = scalar_lea.vmem [#allocation10], %s667_s21  ;;  %s1273_s29 = scalar_lea.hbm %s1326_s4, %s672_s27 }
  0x98   : > { %693 = vmatprep.subr.bf16.mxu0 %v996_v0  ;;  %s504_s1 = sshll.u32 %s337_s14, 4  ;;  %s490_s7 = scalar_lea.sflag [#allocation4], %s1240_s25  ;;  %s1275_s1 = int_to_ptr.vmem [resolvable:$true] %s504_s1 }
  0x99   : > { %s900_s5 = scalar_lea.vmem %s1275_s1, 128  ;;  %p1355_p8 = scmp.ne.s32.totalorder %s1341_s28, 0 }
  0x9a   : > { %p901_p6 = scmp.ne.s32.totalorder %s1275_s1, %s900_s5  ;;  %s998_s18 = smov [#allocation10]  }
  0x9b   : > { %s904_s6 = sshll.u32 %s998_s18, 4  ;;  %s905_s6 = int_to_ptr.vmem [resolvable:$false] %s904_s6 }
  0x9c   : > { %p902_p9 = pnand %p901_p6, %p1355_p8  ;;  %s906_s9 = scalar_lea.vmem %s905_s6, 256 }
  0x9d   : > { %p907_p12 = scmp.lt.s32.totalorder %s1275_s1, %s905_s6  ;;  %p908_p11 = scmp.lt.s32.totalorder %s906_s9, %s900_s5 }
  0x9e   : > { %684 = vmatmul.mubr.msk.bf16.vlgmr.msra.gmra.mrb[0].mxu0 %vm341_vm1, %v339_v5  ;;  %690 = vmatmul.mubr.msk.bf16.vlgmr.msra.gmra.mrb[0].mxu1 %vm341_vm1, %v339_v5  ;;  %p903_p10 = pneg %p902_p9 }
  0x9f   : > { %695 = vmatprep.mubr.msk.bf16.mxu0 %vm997_vm0, %v996_v0  ;;  %694 = vmatpush3.bf16.msra.mxu0 %v446_v7  ;;  %p909_p5 = por %p908_p11, %p907_p12 }
  0xa1   : > { %p910_p4 = pnand %p909_p5, %p903_p10 }
 0x171   : > { %v382_v8 = vpop.f32.mrb[0].mxu0  ;;  %v426_v9 = vpop.f32.mrb[0].mxu1 }
 0x172   : > { %v432_v10 = vmul.f32 %v382_v8, %v382_v8  ;;  %v433_v11 = vmul.f32 %v426_v9, %v426_v9  ;;  %v685_v12 = vpop.f32.mrb[1].mxu0  ;;  %v691_v13 = vpop.f32.mrb[1].mxu1 }
 0x173   : > { %v385_v14 = vpop.f32.mrb[2].mxu0  ;;  %v429_v15 = vpop.f32.mrb[2].mxu1 }
 0x174   : > { %v434_v16 = vadd.f32 %v433_v11, %v432_v10  ;;  %v686_v17 = vpop.f32.mrb[3].mxu0  ;;  %v692_v18 = vpop.f32.mrb[3].mxu1 }
 0x176   : > { %v435_v19 = vmax.f32 %v434_v16, 1e-30 }
 0x178   : > { %778 = vrsqrt.f32 %v435_v19 }
 0x182   : > { %v779_v20 = vpop.eup %778 }
 0x183   : > { %v437_v21 = vmul.f32 %v779_v20, %v434_v16 }
 0x185   : > { %v438_v22 = vpack.c.bf16 %v437_v21, %v437_v21 }
 0x187   : > { %696 = vmatmul.mubr.msk.bf16.vlgmr.msra.gmra.mrb[4].mxu0 %vm440_vm3, %v438_v22 }
 0x25a   : > { %v482_v23 = vpop.f32.mrb[4].mxu0 }
 0x25b   : > { %488 = vst.msk [vmem:[%s337_s14] sm:$0xff] %vm341_vm1, %v482_v23  ;;  %v697_v24 = vpop.f32.mrb[5].mxu0 }
 0x25c   : > { %v485_v25 = vpop.f32.mrb[6].mxu0 }
 0x25d   : > { %913 = shalt.err (!%p910_p4)
}
 0x25e   : > { %s914_s10 = scalar_lea.hbm %s1273_s29, 128  ;;  %s918_s19 = scalar_lea.hbm %s1326_s4, 512 }
 0x25f   : > { %p915_p13 = scmp.ne.s32.totalorder %s1273_s29, %s914_s10  ;;  %p919_p1 = scmp.lt.u32.totalorder %s1273_s29, %s1326_s4 }
 0x260   : > { %p920_p7 = scmp.lt.u32.totalorder %s918_s19, %s914_s10  ;;  %p922_p6 = scmp.lt.u32.totalorder %s914_s10, %s1273_s29 }
 0x261   : > { %p916_p2 = pnand %p915_p13, %p1355_p8 }
 0x262   : > { %p921_p3 = por %p920_p7, %p919_p1 }
 0x263   : > { %p917_p0 = pneg %p916_p2 }
 0x264   : > { %p923_p9 = por %p922_p6, %p921_p3 }
 0x266   : > { %p924_p10 = pnand %p923_p9, %p917_p0 }
 0x268   : > { %927 = shalt.err (!%p924_p10)
}
 0x269   : > { %707 = dma.vmem_to_hbm [thread:$0]  (%p1355_p8), %s1275_s1, 128, %s1273_s29, %s490_s7   ;;  %v698_v26 = vpop.f32.mrb[7].mxu0 }
 0x26a PF: > { %s1356_s24 = sld [smem:[#allocation19_spill]]  ;;  %p727_p12 = scmp.ge.s32.totalorder %s990_s20, 2 }
 0x26b   : > { %s516_s11 = sand.u32 1, %s970_s15  }
 0x26c   : > { %s517_s13 = scalar_lea.sflag [#allocation4], %s516_s11 }
 0x270   : > { %p1357_p11 = scmp.ne.s32.totalorder %s1356_s24, 0 }
 0x272   : > { %p723_p5 = pnand %p727_p12, %p1357_p11 }
 0x274   : > { %965 = dma.done.wait (!%p723_p5), %s517_s13, 128  }
 0x275   : > { %967 = vsyncadd (!%p723_p5), %s517_s13, 4294967168  ;;  %s26_s20 = sadd.s32 1, %s990_s20   ;;  %s1358_s28 = sld [smem:[#allocation15_spill]] }
 0x276   : > { %p23_p4 = scmp.ge.s32.totalorder %s26_s20, 6   ;;  %s1359_s17 = sld [smem:[#allocation18_spill]] }
 0x277   : > { %s1360_s18 = sld [smem:[#allocation16_spill]]  ;;  %s1361_s19 = sld [smem:[#allocation17_spill]] }
 0x278   : > { %s1362_s15 = smov %s974_s16  ;;  %25 = sbr.rel (!%p23_p4) target bundleno = 12 (0xc), region = 118 }
 0x27b   : > { %s1363_s16 = smov %s1358_s28 }
 0x27f   :  { %522 = vsyncpa [#allocation3], 1 }
 0x280   :  { %524 = vsyncpa [#allocation3 + $0x1], 1 }
 0x281   :  { %525 = vsyncpa [#allocation6], 1 }
 0x282   :  { %527 = vsyncpa [#allocation6 + $0x1], 1 }
 0x283   :  { %528 = vsyncpa [#allocation9], 1 }
 0x284   :  { %530 = vsyncpa [#allocation9 + $0x1], 1 }
 0x285   :  { %531 = vsyncpa [#allocation4], 1 }
 0x286   :  { %533 = vsyncpa [#allocation4 + $0x1], 1 }

</bundles_post_ra>
